<compile_context>
chip_gen: v5e
topology: v5e:2x2
jax: 0.10.0
libtpu: 0.0.40
codegen_flags: <defaults>
</compile_context>

<pallas_src>
import jax
import jax.numpy as jnp
from jax.experimental import pallas as pl
from jax.experimental.pallas import tpu as pltpu


# ----------------------------- fused Pallas kernel -------------------------- #

def _make_encoder_kernel(n_blocks):
    """Whole-encoder kernel (single invocation, everything in VMEM)."""

    def kernel(*refs):
        f32 = jnp.float32
        (patches_ref, wstem_ref, bn1_s_ref, bn1_b_ref,
         sup_ref, sdn_ref) = refs[:6]
        blk_refs = refs[6:6 + 3 * n_blocks]
        stem_out, bn1_out, act1_out = refs[6 + 3 * n_blocks:9 + 3 * n_blocks]
        blk_outs = refs[9 + 3 * n_blocks:]

        # conv_stem: stride-2 3x3 conv as ONE lane-dense MXU matmul.
        #   rows    = (n, oh); columns = (ow, tap, cin)  ->  (NH, Wout*K)
        #   weight  = block-diagonal (Wout*K, Wout*Cout)
        stem = jnp.dot(patches_ref[...], wstem_ref[...],
                       preferred_element_type=f32)            # (NH, Wout*Cout)
        stem_out[...] = stem                                   # 128-lane dense store

        # bn1 (inference affine) + act1 (ReLU): data never leaves VMEM.
        bn1 = stem * bn1_s_ref[...] + bn1_b_ref[...]
        bn1_out[...] = bn1
        y = jnp.maximum(bn1, 0.0)
        act1_out[...] = y

        sup = sup_ref[...]   # (NH, NH): "previous row", zeroed where oh == 0
        sdn = sdn_ref[...]   # (NH, NH): "next row",     zeroed where oh == H-1

        for b in range(n_blocks):
            wb_ref, s_ref, t_ref = blk_refs[3 * b:3 * b + 3]
            # 3x3 stride-1 conv directly on the lane-dense (NH, W*C) slab:
            #   row taps (dh=0/2): tiny shift matmuls (zero padding folded in),
            #   column taps + channel mixing: banded (W*C, W*C) weight per dh.
            y_up = jnp.dot(sup, y, preferred_element_type=f32)
            y_dn = jnp.dot(sdn, y, preferred_element_type=f32)
            acc = jnp.dot(y_up, wb_ref[0], preferred_element_type=f32)
            acc = acc + jnp.dot(y, wb_ref[1], preferred_element_type=f32)
            acc = acc + jnp.dot(y_dn, wb_ref[2], preferred_element_type=f32)
            # fused BN affine + ReLU epilogue
            y = jnp.maximum(acc * s_ref[...] + t_ref[...], 0.0)
            blk_outs[b][...] = y                               # 128-lane dense store

    return kernel


# --------------------------- wrapper-side packing --------------------------- #

def _im2col_rows(x_nhwc, kh, kw, stride, pad):
    """(N,H,W,C) -> lane-dense patch rows (N*Hout, Wout*kh*kw*C)."""
    n, h, w, c = x_nhwc.shape
    xp = jnp.pad(x_nhwc, ((0, 0), (pad, pad), (pad, pad), (0, 0)))
    hout = (h + 2 * pad - kh) // stride + 1
    wout = (w + 2 * pad - kw) // stride + 1
    cols = []
    for ih in range(kh):
        for iw in range(kw):
            cols.append(
                xp[:, ih:ih + hout * stride:stride, iw:iw + wout * stride:stride, :])
    patches = jnp.stack(cols, axis=3)          # (N, Hout, Wout, kh*kw, C)
    return patches.reshape(n * hout, wout * kh * kw * c), hout, wout


def _w_oihw_to_mat(w_oihw):
    # (Cout,Cin,KH,KW) -> (KH*KW*Cin, Cout), matching _im2col_rows flattening
    cout, cin, kh, kw = w_oihw.shape
    return jnp.transpose(w_oihw, (2, 3, 1, 0)).reshape(kh * kw * cin, cout)


def _stem_weight_lane_dense(w_oihw, wout):
    """Block-diagonal expansion so the stem conv is a single lane-dense matmul."""
    wm = _w_oihw_to_mat(w_oihw)                # (K, Cout)
    k, cout = wm.shape
    wexp = jnp.zeros((wout * k, wout * cout), jnp.float32)
    for ow in range(wout):
        wexp = wexp.at[ow * k:(ow + 1) * k, ow * cout:(ow + 1) * cout].set(wm)
    return wexp


def _block_weight_banded(w_oihw, w):
    """Per-dh banded (W*Cin, W*Cout) weights for a 3x3 s=1 p=1 conv on (NH, W*C)."""
    cout, cin, kh, kw = w_oihw.shape
    wb = jnp.zeros((kh, w * cin, w * cout), jnp.float32)
    for dh in range(kh):
        for ow_out in range(w):
            for dw in range(kw):
                ow_in = ow_out + dw - 1
                if 0 <= ow_in < w:
                    wb = wb.at[dh,
                               ow_in * cin:(ow_in + 1) * cin,
                               ow_out * cout:(ow_out + 1) * cout].set(
                                   w_oihw[:, :, dh, dw].T)
    return wb


def _bn_fold_lane_dense(gamma, beta, mean, var, w, eps=1e-5):
    """Fold inference BN into per-channel scale/shift, tiled to W*C lanes."""
    scale = gamma / jnp.sqrt(var + eps)
    shift = beta - mean * scale
    return (jnp.tile(scale, w).reshape(1, -1).astype(jnp.float32),
            jnp.tile(shift, w).reshape(1, -1).astype(jnp.float32))


# --------------------------- Encoder forward -------------------------------- #

def encoder_forward(x_nchw, params):
    """Mirrors Encoder.forward: collect every intermediate feature (NCHW)."""
    # TODO(synk): the dynamic walk over backend._modules is Python-level
    # orchestration; it is reproduced statically for the synthetic backend.
    n = x_nchw.shape[0]
    x_nhwc = jnp.transpose(x_nchw, (0, 2, 3, 1))

    stem_w = params["stem_w"]
    c1 = stem_w.shape[0]
    n_blocks = len(params["blocks"])

    # stem im2col (tiny, one-time; Cin=4 so only ~2.25x the input bytes)
    patches, hout, wout = _im2col_rows(x_nhwc, 3, 3, stride=2, pad=1)
    nh, wc = n * hout, wout * c1

    wstem = _stem_weight_lane_dense(stem_w, wout)
    bn1_s, bn1_b = _bn_fold_lane_dense(*params["bn1"], wout)

    # masked row-shift matrices (fold zero-padding in H and image boundaries)
    r = jnp.arange(nh)
    oh = r % hout
    sup = ((r[:, None] - 1 == r[None, :]) &
           (oh[:, None] != 0)).astype(jnp.float32)           # row r <- row r-1
    sdn = ((r[:, None] + 1 == r[None, :]) &
           (oh[:, None] != hout - 1)).astype(jnp.float32)    # row r <- row r+1

    blk_args = []
    for blk in params["blocks"]:
        blk_args.append(_block_weight_banded(blk["w"], wout))
        s, t = _bn_fold_lane_dense(*blk["bn"], wout)
        blk_args += [s, t]

    # VMEM budget guard (fused kernel keeps everything resident).
    n_feats = 3 + n_blocks
    vmem_bytes = 4 * (patches.size + wstem.size + bn1_s.size + bn1_b.size +
                      sup.size + sdn.size + sum(a.size for a in blk_args) +
                      n_feats * nh * wc)
    if vmem_bytes > 16 * 1024 * 1024:
        # TODO(synk): for real image sizes, tile the NH rows over a 1-D
        # "parallel" grid (with a one-row halo per tile) instead of keeping
        # the whole encoder resident in VMEM.
        raise NotImplementedError("input too large for single-block fused encoder kernel")

    out_shapes = tuple(jax.ShapeDtypeStruct((nh, wc), jnp.float32)
                       for _ in range(n_feats))
    outs = pl.pallas_call(
        _make_encoder_kernel(n_blocks),
        out_shape=out_shapes,
        compiler_params=pltpu.CompilerParams(vmem_limit_bytes=32 * 1024 * 1024),
    )(patches, wstem, bn1_s, bn1_b, sup, sdn, *blk_args)

    # unpack lane-dense slabs -> NCHW features (layout plumbing done once, last)
    def to_nchw(slab):
        return jnp.transpose(slab.reshape(n, hout, wout, c1), (0, 3, 1, 2))

    return [x_nchw] + [to_nchw(t) for t in outs]


# --------------------------- pure-JAX reference ----------------------------- #

def _ref_conv(x_nhwc, w_oihw, stride, pad):
    w_hwio = jnp.transpose(w_oihw, (2, 3, 1, 0))
    return jax.lax.conv_general_dilated(
        x_nhwc, w_hwio, window_strides=(stride, stride),
        padding=[(pad, pad), (pad, pad)],
        dimension_numbers=("NHWC", "HWIO", "NHWC"))


def _ref_bn(x, gamma, beta, mean, var, eps=1e-5):
    return (x - mean) / jnp.sqrt(var + eps) * gamma + beta


def reference_forward(x_nchw, params):
    def to_nhwc(t):
        return jnp.transpose(t, (0, 2, 3, 1))

    def to_nchw(t):
        return jnp.transpose(t, (0, 3, 1, 2))

    features = [x_nchw]
    x = to_nhwc(x_nchw)
    x = _ref_conv(x, params["stem_w"], 2, 1)
    features.append(to_nchw(x))
    x = _ref_bn(x, *params["bn1"])
    features.append(to_nchw(x))
    x = jnp.maximum(x, 0.0)
    features.append(to_nchw(x))
    for blk in params["blocks"]:
        x = _ref_conv(x, blk["w"], 1, 1)
        x = jnp.maximum(_ref_bn(x, *blk["bn"]), 0.0)
        features.append(to_nchw(x))
    return features


# --------------------------------- main ------------------------------------- #

def make_params(key, cin=4, c1=16):
    ks = jax.random.split(key, 16)

    def bn_params(k, c):
        k1, k2, k3, k4 = jax.random.split(k, 4)
        gamma = 1.0 + 0.1 * jax.random.normal(k1, (c,), jnp.float32)
        beta = 0.1 * jax.random.normal(k2, (c,), jnp.float32)
        mean = 0.1 * jax.random.normal(k3, (c,), jnp.float32)
        var = 1.0 + 0.1 * jnp.abs(jax.random.normal(k4, (c,), jnp.float32))
        return (gamma, beta, mean, var)

    params = {
        "stem_w": 0.2 * jax.random.normal(ks[0], (c1, cin, 3, 3), jnp.float32),
        "bn1": bn_params(ks[1], c1),
        "blocks": [
            {"w": 0.1 * jax.random.normal(ks[2], (c1, c1, 3, 3), jnp.float32),
             "bn": bn_params(ks[3], c1)},
            {"w": 0.1 * jax.random.normal(ks[4], (c1, c1, 3, 3), jnp.float32),
             "bn": bn_params(ks[5], c1)},
        ],
    }
    return params


if __name__ == "__main__":
    key = jax.random.PRNGKey(0)
    kx, kp = jax.random.split(key)
    N, Cin, H, W = 2, 4, 16, 16
    x = jax.random.normal(kx, (N, Cin, H, W), jnp.float32)   # NCHW, like PyTorch
    params = make_params(kp)

    feats = jax.jit(encoder_forward)(x, params)
    feats = jax.block_until_ready(feats)

    ref = reference_forward(x, params)
    assert len(feats) == len(ref) == 6
    for a, b in zip(feats, ref):
        assert a.shape == b.shape, (a.shape, b.shape)
        assert jnp.allclose(a, b, atol=1e-3, rtol=1e-3), float(jnp.abs(a - b).max())

    print("KERNEL_OK")
</pallas_src>

<mosaic_0001>
module attributes {stable_mosaic.version = 11 : i64} {
  func.func @kernel(%arg0: memref<16x288xf32, #tpu.memory_space<vmem>>, %arg1: memref<288x128xf32, #tpu.memory_space<vmem>>, %arg2: memref<1x128xf32, #tpu.memory_space<vmem>>, %arg3: memref<1x128xf32, #tpu.memory_space<vmem>>, %arg4: memref<16x16xf32, #tpu.memory_space<vmem>>, %arg5: memref<16x16xf32, #tpu.memory_space<vmem>>, %arg6: memref<3x128x128xf32, #tpu.memory_space<vmem>>, %arg7: memref<1x128xf32, #tpu.memory_space<vmem>>, %arg8: memref<1x128xf32, #tpu.memory_space<vmem>>, %arg9: memref<3x128x128xf32, #tpu.memory_space<vmem>>, %arg10: memref<1x128xf32, #tpu.memory_space<vmem>>, %arg11: memref<1x128xf32, #tpu.memory_space<vmem>>, %arg12: memref<16x128xf32, #tpu.memory_space<vmem>>, %arg13: memref<16x128xf32, #tpu.memory_space<vmem>>, %arg14: memref<16x128xf32, #tpu.memory_space<vmem>>, %arg15: memref<16x128xf32, #tpu.memory_space<vmem>>, %arg16: memref<16x128xf32, #tpu.memory_space<vmem>>) attributes {dimension_semantics = [], scalar_prefetch = 0 : i64, scratch_operands = 0 : i64, tpu.core_type = #tpu.core_type<tc>} {
    %c0 = arith.constant 0 : index
    %c0_0 = arith.constant 0 : index
    %0 = vector.load %arg0[%c0, %c0_0] : memref<16x288xf32, #tpu.memory_space<vmem>>, vector<16x288xf32>
    %c0_1 = arith.constant 0 : index
    %c0_2 = arith.constant 0 : index
    %1 = vector.load %arg1[%c0_1, %c0_2] : memref<288x128xf32, #tpu.memory_space<vmem>>, vector<288x128xf32>
    %cst = arith.constant dense<0.000000e+00> : vector<16x128xf32>
    %2 = tpu.matmul %0, %1, %cst {dimension_numbers = #tpu.dot_dimension_numbers<[1], [0], [0], [1], [0, 0, 1, 1], [], []>} : vector<16x288xf32>, vector<288x128xf32>, vector<16x128xf32> -> vector<16x128xf32>
    %c0_3 = arith.constant 0 : index
    %c0_4 = arith.constant 0 : index
    %3 = vector.load %arg12[%c0_3, %c0_4] : memref<16x128xf32, #tpu.memory_space<vmem>>, vector<16x128xf32>
    tpu.vector_store %arg12[%c0_3, %c0_4], %2 {strides = array<i32>} : memref<16x128xf32, #tpu.memory_space<vmem>>, vector<16x128xf32>,
    %c0_5 = arith.constant 0 : index
    %c0_6 = arith.constant 0 : index
    %4 = vector.load %arg2[%c0_5, %c0_6] : memref<1x128xf32, #tpu.memory_space<vmem>>, vector<1x128xf32>
    %5 = vector.broadcast %4 : vector<1x128xf32> to vector<16x128xf32>
    %6 = arith.mulf %2, %5 : vector<16x128xf32>
    %c0_7 = arith.constant 0 : index
    %c0_8 = arith.constant 0 : index
    %7 = vector.load %arg3[%c0_7, %c0_8] : memref<1x128xf32, #tpu.memory_space<vmem>>, vector<1x128xf32>
    %8 = vector.broadcast %7 : vector<1x128xf32> to vector<16x128xf32>
    %9 = arith.addf %6, %8 : vector<16x128xf32>
    %c0_9 = arith.constant 0 : index
    %c0_10 = arith.constant 0 : index
    %10 = vector.load %arg13[%c0_9, %c0_10] : memref<16x128xf32, #tpu.memory_space<vmem>>, vector<16x128xf32>
    tpu.vector_store %arg13[%c0_9, %c0_10], %9 {strides = array<i32>} : memref<16x128xf32, #tpu.memory_space<vmem>>, vector<16x128xf32>,
    %cst_11 = arith.constant 0.000000e+00 : f32
    %11 = vector.broadcast %cst_11 : f32 to vector<16x128xf32>
    %12 = arith.maximumf %9, %11 : vector<16x128xf32>
    %c0_12 = arith.constant 0 : index
    %c0_13 = arith.constant 0 : index
    %13 = vector.load %arg14[%c0_12, %c0_13] : memref<16x128xf32, #tpu.memory_space<vmem>>, vector<16x128xf32>
    tpu.vector_store %arg14[%c0_12, %c0_13], %12 {strides = array<i32>} : memref<16x128xf32, #tpu.memory_space<vmem>>, vector<16x128xf32>,
    %c0_14 = arith.constant 0 : index
    %c0_15 = arith.constant 0 : index
    %14 = vector.load %arg4[%c0_14, %c0_15] : memref<16x16xf32, #tpu.memory_space<vmem>>, vector<16x16xf32>
    %c0_16 = arith.constant 0 : index
    %c0_17 = arith.constant 0 : index
    %15 = vector.load %arg5[%c0_16, %c0_17] : memref<16x16xf32, #tpu.memory_space<vmem>>, vector<16x16xf32>
    %cst_18 = arith.constant dense<0.000000e+00> : vector<16x128xf32>
    %16 = tpu.matmul %14, %12, %cst_18 {dimension_numbers = #tpu.dot_dimension_numbers<[1], [0], [0], [1], [0, 0, 1, 1], [], []>} : vector<16x16xf32>, vector<16x128xf32>, vector<16x128xf32> -> vector<16x128xf32>
    %cst_19 = arith.constant dense<0.000000e+00> : vector<16x128xf32>
    %17 = tpu.matmul %15, %12, %cst_19 {dimension_numbers = #tpu.dot_dimension_numbers<[1], [0], [0], [1], [0, 0, 1, 1], [], []>} : vector<16x16xf32>, vector<16x128xf32>, vector<16x128xf32> -> vector<16x128xf32>
    %c0_20 = arith.constant 0 : index
    %c0_21 = arith.constant 0 : index
    %c0_22 = arith.constant 0 : index
    %18 = vector.load %arg6[%c0_20, %c0_21, %c0_22] : memref<3x128x128xf32, #tpu.memory_space<vmem>>, vector<1x128x128xf32>
    %19 = vector.shape_cast %18 : vector<1x128x128xf32> to vector<128x128xf32>
    %cst_23 = arith.constant dense<0.000000e+00> : vector<16x128xf32>
    %20 = tpu.matmul %16, %19, %cst_23 {dimension_numbers = #tpu.dot_dimension_numbers<[1], [0], [0], [1], [0, 0, 1, 1], [], []>} : vector<16x128xf32>, vector<128x128xf32>, vector<16x128xf32> -> vector<16x128xf32>
    %c1 = arith.constant 1 : index
    %c0_24 = arith.constant 0 : index
    %c0_25 = arith.constant 0 : index
    %21 = vector.load %arg6[%c1, %c0_24, %c0_25] : memref<3x128x128xf32, #tpu.memory_space<vmem>>, vector<1x128x128xf32>
    %22 = vector.shape_cast %21 : vector<1x128x128xf32> to vector<128x128xf32>
    %cst_26 = arith.constant dense<0.000000e+00> : vector<16x128xf32>
    %23 = tpu.matmul %12, %22, %cst_26 {dimension_numbers = #tpu.dot_dimension_numbers<[1], [0], [0], [1], [0, 0, 1, 1], [], []>} : vector<16x128xf32>, vector<128x128xf32>, vector<16x128xf32> -> vector<16x128xf32>
    %24 = arith.addf %20, %23 : vector<16x128xf32>
    %c2 = arith.constant 2 : index
    %c0_27 = arith.constant 0 : index
    %c0_28 = arith.constant 0 : index
    %25 = vector.load %arg6[%c2, %c0_27, %c0_28] : memref<3x128x128xf32, #tpu.memory_space<vmem>>, vector<1x128x128xf32>
    %26 = vector.shape_cast %25 : vector<1x128x128xf32> to vector<128x128xf32>
    %cst_29 = arith.constant dense<0.000000e+00> : vector<16x128xf32>
    %27 = tpu.matmul %17, %26, %cst_29 {dimension_numbers = #tpu.dot_dimension_numbers<[1], [0], [0], [1], [0, 0, 1, 1], [], []>} : vector<16x128xf32>, vector<128x128xf32>, vector<16x128xf32> -> vector<16x128xf32>
    %28 = arith.addf %24, %27 : vector<16x128xf32>
    %c0_30 = arith.constant 0 : index
    %c0_31 = arith.constant 0 : index
    %29 = vector.load %arg7[%c0_30, %c0_31] : memref<1x128xf32, #tpu.memory_space<vmem>>, vector<1x128xf32>
    %30 = vector.broadcast %29 : vector<1x128xf32> to vector<16x128xf32>
    %31 = arith.mulf %28, %30 : vector<16x128xf32>
    %c0_32 = arith.constant 0 : index
    %c0_33 = arith.constant 0 : index
    %32 = vector.load %arg8[%c0_32, %c0_33] : memref<1x128xf32, #tpu.memory_space<vmem>>, vector<1x128xf32>
    %33 = vector.broadcast %32 : vector<1x128xf32> to vector<16x128xf32>
    %34 = arith.addf %31, %33 : vector<16x128xf32>
    %cst_34 = arith.constant 0.000000e+00 : f32
    %35 = vector.broadcast %cst_34 : f32 to vector<16x128xf32>
    %36 = arith.maximumf %34, %35 : vector<16x128xf32>
    %c0_35 = arith.constant 0 : index
    %c0_36 = arith.constant 0 : index
    %37 = vector.load %arg15[%c0_35, %c0_36] : memref<16x128xf32, #tpu.memory_space<vmem>>, vector<16x128xf32>
    tpu.vector_store %arg15[%c0_35, %c0_36], %36 {strides = array<i32>} : memref<16x128xf32, #tpu.memory_space<vmem>>, vector<16x128xf32>,
    %cst_37 = arith.constant dense<0.000000e+00> : vector<16x128xf32>
    %38 = tpu.matmul %14, %36, %cst_37 {dimension_numbers = #tpu.dot_dimension_numbers<[1], [0], [0], [1], [0, 0, 1, 1], [], []>} : vector<16x16xf32>, vector<16x128xf32>, vector<16x128xf32> -> vector<16x128xf32>
    %cst_38 = arith.constant dense<0.000000e+00> : vector<16x128xf32>
    %39 = tpu.matmul %15, %36, %cst_38 {dimension_numbers = #tpu.dot_dimension_numbers<[1], [0], [0], [1], [0, 0, 1, 1], [], []>} : vector<16x16xf32>, vector<16x128xf32>, vector<16x128xf32> -> vector<16x128xf32>
    %c0_39 = arith.constant 0 : index
    %c0_40 = arith.constant 0 : index
    %c0_41 = arith.constant 0 : index
    %40 = vector.load %arg9[%c0_39, %c0_40, %c0_41] : memref<3x128x128xf32, #tpu.memory_space<vmem>>, vector<1x128x128xf32>
    %41 = vector.shape_cast %40 : vector<1x128x128xf32> to vector<128x128xf32>
    %cst_42 = arith.constant dense<0.000000e+00> : vector<16x128xf32>
    %42 = tpu.matmul %38, %41, %cst_42 {dimension_numbers = #tpu.dot_dimension_numbers<[1], [0], [0], [1], [0, 0, 1, 1], [], []>} : vector<16x128xf32>, vector<128x128xf32>, vector<16x128xf32> -> vector<16x128xf32>
    %c1_43 = arith.constant 1 : index
    %c0_44 = arith.constant 0 : index
    %c0_45 = arith.constant 0 : index
    %43 = vector.load %arg9[%c1_43, %c0_44, %c0_45] : memref<3x128x128xf32, #tpu.memory_space<vmem>>, vector<1x128x128xf32>
    %44 = vector.shape_cast %43 : vector<1x128x128xf32> to vector<128x128xf32>
    %cst_46 = arith.constant dense<0.000000e+00> : vector<16x128xf32>
    %45 = tpu.matmul %36, %44, %cst_46 {dimension_numbers = #tpu.dot_dimension_numbers<[1], [0], [0], [1], [0, 0, 1, 1], [], []>} : vector<16x128xf32>, vector<128x128xf32>, vector<16x128xf32> -> vector<16x128xf32>
    %46 = arith.addf %42, %45 : vector<16x128xf32>
    %c2_47 = arith.constant 2 : index
    %c0_48 = arith.constant 0 : index
    %c0_49 = arith.constant 0 : index
    %47 = vector.load %arg9[%c2_47, %c0_48, %c0_49] : memref<3x128x128xf32, #tpu.memory_space<vmem>>, vector<1x128x128xf32>
    %48 = vector.shape_cast %47 : vector<1x128x128xf32> to vector<128x128xf32>
    %cst_50 = arith.constant dense<0.000000e+00> : vector<16x128xf32>
    %49 = tpu.matmul %39, %48, %cst_50 {dimension_numbers = #tpu.dot_dimension_numbers<[1], [0], [0], [1], [0, 0, 1, 1], [], []>} : vector<16x128xf32>, vector<128x128xf32>, vector<16x128xf32> -> vector<16x128xf32>
    %50 = arith.addf %46, %49 : vector<16x128xf32>
    %c0_51 = arith.constant 0 : index
    %c0_52 = arith.constant 0 : index
    %51 = vector.load %arg10[%c0_51, %c0_52] : memref<1x128xf32, #tpu.memory_space<vmem>>, vector<1x128xf32>
    %52 = vector.broadcast %51 : vector<1x128xf32> to vector<16x128xf32>
    %53 = arith.mulf %50, %52 : vector<16x128xf32>
    %c0_53 = arith.constant 0 : index
    %c0_54 = arith.constant 0 : index
    %54 = vector.load %arg11[%c0_53, %c0_54] : memref<1x128xf32, #tpu.memory_space<vmem>>, vector<1x128xf32>
    %55 = vector.broadcast %54 : vector<1x128xf32> to vector<16x128xf32>
    %56 = arith.addf %53, %55 : vector<16x128xf32>
    %cst_55 = arith.constant 0.000000e+00 : f32
    %57 = vector.broadcast %cst_55 : f32 to vector<16x128xf32>
    %58 = arith.maximumf %56, %57 : vector<16x128xf32>
    %c0_56 = arith.constant 0 : index
    %c0_57 = arith.constant 0 : index
    %59 = vector.load %arg16[%c0_56, %c0_57] : memref<16x128xf32, #tpu.memory_space<vmem>>, vector<16x128xf32>
    tpu.vector_store %arg16[%c0_56, %c0_57], %58 {strides = array<i32>} : memref<16x128xf32, #tpu.memory_space<vmem>>, vector<16x128xf32>,
    return
  }
}

</mosaic_0001>

<bundles_post_ra>
// kernel: tile.33
= control target key start
LH: loop header
LB: loop body
LE: loop exit
PB: predicated region body
PF: predicated region fallthrough
CT: control target
= control target key end

     0   :  { %s22_s0 = inlined_call_operand.vmem [shape: f32[16], index: 0, kind: input, shape index: {}]   ;;  %s23_s1 = inlined_call_operand.vmem [shape: f32[8,16], index: 1, kind: output, shape index: {}]  }
   0x1   :  { %v4_v0 = vld [vmem:[%s22_s0] ss:$0 sm:$0xff] }
   0x2   :  { %5 = vst [vmem:[%s23_s1] sm:$0xff] %v4_v0 }

// kernel: tile.34
= control target key start
LH: loop header
LB: loop body
LE: loop exit
PB: predicated region body
PF: predicated region fallthrough
CT: control target
= control target key end

     0   :  { %s67_s10 = smov 112   ;;  %s68_s11 = smov 80   ;;  %vm3_vm0 = vcmask 130048   ;;  %vm9_vm1 = vcmask 1048448   ;;  %vm15_vm2 = vcmask 917248   ;;  %vm21_vm3 = vcmask 786048   ;;  %s111_s0 = inlined_call_operand.vmem [shape: f32[8,16], index: 0, kind: input, shape index: {}]   ;;  %s112_s1 = inlined_call_operand.vmem [shape: f32[1,128], index: 1, kind: output, shape index: {}]  }
   0x1   :  { %v53_v0 = vld [vmem:[%s111_s0 + $0x7] sm:$0x1]   ;;  %v55_v1 = vld [vmem:[%s111_s0 + $0x5] sm:$0x1]   ;;  %v57_v2 = vld [vmem:[%s111_s0 + $0x3] sm:$0x1]  }
   0x2   :  { %7 = vrot.lane.b32.xlu0 %v53_v0, %s67_s10  ;;  %19 = vrot.lane.b32.xlu1 %v55_v1, %s68_s11  ;;  %s69_s14 = smov 48   ;;  %v54_v3 = vld [vmem:[%s111_s0 + $0x6] sm:$0x1]   ;;  %v56_v4 = vld [vmem:[%s111_s0 + $0x4] sm:$0x1]   ;;  %s70_s21 = smov 96  }
   0x3   :  { %31 = vrot.lane.b32.xlu2 %v57_v2, %s69_s14  ;;  %v58_v5 = vld [vmem:[%s111_s0 + $0x2] sm:$0x1]   ;;  %s71_s22 = smov 64   ;;  %s72_s23 = smov 32   ;;  %v59_v6 = vld [vmem:[%s111_s0 + $0x1] sm:$0x1]  }
   0x4   :  { %s73_s26 = smov 16   ;;  %v2_v7 = vld [vmem:[%s111_s0] sm:$0x1]   ;;  %vm27_vm4 = vcmask 654848   ;;  %vm33_vm5 = vcmask 523648   ;;  %vm39_vm6 = vcmask 392448  }
   0x5   :  { %4 = vst.msk [vmem:[#allocation0] sm:$0x1] %vm3_vm0, %v2_v7   ;;  %vm45_vm7 = vcmask 261248  }
   0xa   :  { %13 = vrot.lane.b32.xlu0 %v54_v3, %s70_s21  ;;  %25 = vrot.lane.b32.xlu1 %v56_v4, %s71_s22 }
   0xb   :  { %37 = vrot.lane.b32.xlu2 %v58_v5, %s72_s23 }
  0x12   :  { %43 = vrot.lane.b32.xlu0 %v59_v6, %s73_s26 }
  0x5d   :  { %v32_v8 = vpop.permute.xlu2 %31  }
  0x65   :  { %v38_v9 = vpop.permute.xlu2 %37  }
  0x74   :  { %v8_v10 = vpop.permute.xlu0 %7   ;;  %v20_v11 = vpop.permute.xlu1 %19  }
  0x75   :  { %10 = vst.msk [vmem:[#allocation0] sm:$0x1] %vm9_vm1, %v8_v10  }
  0x7c   :  { %v14_v12 = vpop.permute.xlu0 %13   ;;  %v26_v13 = vpop.permute.xlu1 %25  }
  0x7d   :  { %16 = vst.msk [vmem:[#allocation0] sm:$0x1] %vm15_vm2, %v14_v12  }
  0x7e   :  { %22 = vst.msk [vmem:[#allocation0] sm:$0x1] %vm21_vm3, %v20_v11  }
  0x7f   :  { %28 = vst.msk [vmem:[#allocation0] sm:$0x1] %vm27_vm4, %v26_v13  }
  0x80   :  { %34 = vst.msk [vmem:[#allocation0] sm:$0x1] %vm33_vm5, %v32_v8  }
  0x81   :  { %40 = vst.msk [vmem:[#allocation0] sm:$0x1] %vm39_vm6, %v38_v9  }
  0x84   :  { %v44_v14 = vpop.permute.xlu0 %43  }
  0x85   :  { %46 = vst.msk [vmem:[#allocation0] sm:$0x1] %vm45_vm7, %v44_v14  }
  0x8c   :  { %v49_v15 = vld [vmem:[#allocation0] sm:$0x1] }
  0x8d   :  { %52 = vst [vmem:[%s112_s1] sm:$0x1] %v49_v15 }

// kernel: encoder_forward.1
= control target key start
LH: loop header
LB: loop body
LE: loop exit
PB: predicated region body
PF: predicated region fallthrough
CT: control target
= control target key end

     0   :  { %vm88_vm0 = vcmask 261120   ;;  %vm188_vm1 = vcmask 130048   ;;  %s1262_s1 = inlined_call_operand.vmem [shape: f32[288,128], index: 1, kind: input, shape index: {}]   ;;  %s1263_s6 = inlined_call_operand.vmem [shape: f32[3,128,128], index: 6, kind: input, shape index: {}]   ;;  %s1264_s0 = inlined_call_operand.vmem [shape: f32[16,288], index: 0, kind: input, shape index: {}]   ;;  %s1265_s2 = inlined_call_operand.vmem [shape: f32[1,128], index: 2, kind: input, shape index: {}]   ;;  %s1266_s3 = inlined_call_operand.vmem [shape: f32[1,128], index: 3, kind: input, shape index: {}]   ;;  %s1267_s12 = inlined_call_operand.vmem [shape: f32[16,128], index: 12, kind: output, shape index: {0}]   ;;  %s1268_s13 = inlined_call_operand.vmem [shape: f32[16,128], index: 13, kind: output, shape index: {1}]   ;;  %s1269_s14 = inlined_call_operand.vmem [shape: f32[16,128], index: 14, kind: output, shape index: {2}]   ;;  %s1270_s4 = inlined_call_operand.vmem [shape: f32[16,16], index: 4, kind: input, shape index: {}]   ;;  %s1271_s5 = inlined_call_operand.vmem [shape: f32[16,16], index: 5, kind: input, shape index: {}]   ;;  %s1272_s7 = inlined_call_operand.vmem [shape: f32[1,128], index: 7, kind: input, shape index: {}]   ;;  %s1273_s8 = inlined_call_operand.vmem [shape: f32[1,128], index: 8, kind: input, shape index: {}]   ;;  %s1274_s15 = inlined_call_operand.vmem [shape: f32[16,128], index: 15, kind: output, shape index: {3}]   ;;  %s1275_s9 = inlined_call_operand.vmem [shape: f32[3,128,128], index: 9, kind: input, shape index: {}]   ;;  %s1276_s10 = inlined_call_operand.vmem [shape: f32[1,128], index: 10, kind: input, shape index: {}]   ;;  %s1277_s11 = inlined_call_operand.vmem [shape: f32[1,128], index: 11, kind: input, shape index: {}]   ;;  %s1278_s16 = inlined_call_operand.vmem [shape: f32[16,128], index: 16, kind: output, shape index: {4}]  }
   0x1   :  { %1280 = sst [smem:[#allocation2_spill]] %s1262_s1  ;;  %v608_v28 = vld [vmem:[%s1263_s6 + $0xf8] sm:$0xff]  ;;  %v607_v29 = vld [vmem:[%s1263_s6 + $0xf0] sm:$0xff]  ;;  %v606_v32 = vld [vmem:[%s1263_s6 + $0xe8] sm:$0xff] }
   0x2   :  { %s1281_s23 = sld [smem:[#allocation2_spill]]  ;;  %280 = vmatpush.msra.mxu2 %v608_v28  ;;  %v46_v35 = vld [vmem:[%s1264_s0] sm:$0xff]  ;;  %v47_v36 = vld [vmem:[%s1264_s0 + $0x8] sm:$0xff]  ;;  %v49_v41 = vld [vmem:[%s1264_s0 + $0x18] sm:$0xff] }
   0x3   :  { %v50_v42 = vld [vmem:[%s1264_s0 + $0x20] sm:$0xff]  ;;  %v48_v43 = vld [vmem:[%s1264_s0 + $0x10] sm:$0xff]  ;;  %v51_v44 = vld [vmem:[%s1264_s0 + $0x28] sm:$0xff] }
   0x4   :  { %281 = vmatpush.msra.mxu2 %v607_v29  ;;  %v605_v45 = vld [vmem:[%s1263_s6 + $0xe0] sm:$0xff]  ;;  %v604_v46 = vld [vmem:[%s1263_s6 + $0xd8] sm:$0xff]  ;;  %v603_v47 = vld [vmem:[%s1263_s6 + $0xd0] sm:$0xff] }
   0x5   :  { %v602_v48 = vld [vmem:[%s1263_s6 + $0xc8] sm:$0xff]  ;;  %v601_v49 = vld [vmem:[%s1263_s6 + $0xc0] sm:$0xff]  ;;  %v600_v50 = vld [vmem:[%s1263_s6 + $0xb8] sm:$0xff] }
   0x6   :  { %282 = vmatpush.msra.mxu2 %v606_v32  ;;  %v599_v51 = vld [vmem:[%s1263_s6 + $0xb0] sm:$0xff]  ;;  %v598_v52 = vld [vmem:[%s1263_s6 + $0xa8] sm:$0xff]  ;;  %v597_v53 = vld [vmem:[%s1263_s6 + $0xa0] sm:$0xff] }
   0x7   :  { %v596_v54 = vld [vmem:[%s1263_s6 + $0x98] sm:$0xff]  ;;  %v595_v55 = vld [vmem:[%s1263_s6 + $0x90] sm:$0xff]  ;;  %v594_v56 = vld [vmem:[%s1263_s6 + $0x88] sm:$0xff] }
   0x8   :  { %v67_v0 = vld [vmem:[%s1281_s23 + $0x78] sm:$0xff]  ;;  %v66_v2 = vld [vmem:[%s1281_s23 + $0x70] sm:$0xff]  ;;  %v65_v4 = vld [vmem:[%s1281_s23 + $0x68] sm:$0xff]  ;;  %283 = vmatpush.msra.mxu2 %v605_v45 }
   0x9   :  { %v83_v1 = vld [vmem:[%s1281_s23 + $0xf8] sm:$0xff]  ;;  %95 = vmatpush.msra.mxu0 %v67_v0  ;;  %v82_v3 = vld [vmem:[%s1281_s23 + $0xf0] sm:$0xff]  ;;  %v81_v5 = vld [vmem:[%s1281_s23 + $0xe8] sm:$0xff] }
   0xa   :  { %118 = vmatpush.msra.mxu1 %v83_v1  ;;  %v64_v6 = vld [vmem:[%s1281_s23 + $0x60] sm:$0xff]  ;;  %v63_v8 = vld [vmem:[%s1281_s23 + $0x58] sm:$0xff]  ;;  %v62_v10 = vld [vmem:[%s1281_s23 + $0x50] sm:$0xff]  ;;  %284 = vmatpush.msra.mxu2 %v604_v46 }
   0xb   :  { %96 = vmatpush.msra.mxu0 %v66_v2  ;;  %v80_v7 = vld [vmem:[%s1281_s23 + $0xe0] sm:$0xff]  ;;  %v79_v9 = vld [vmem:[%s1281_s23 + $0xd8] sm:$0xff]  ;;  %v78_v11 = vld [vmem:[%s1281_s23 + $0xd0] sm:$0xff] }
   0xc   :  { %119 = vmatpush.msra.mxu1 %v82_v3  ;;  %v61_v12 = vld [vmem:[%s1281_s23 + $0x48] sm:$0xff]  ;;  %v60_v14 = vld [vmem:[%s1281_s23 + $0x40] sm:$0xff]  ;;  %v59_v16 = vld [vmem:[%s1281_s23 + $0x38] sm:$0xff]  ;;  %285 = vmatpush.msra.mxu2 %v603_v47 }
   0xd   :  { %97 = vmatpush.msra.mxu0 %v65_v4  ;;  %v77_v13 = vld [vmem:[%s1281_s23 + $0xc8] sm:$0xff]  ;;  %v76_v15 = vld [vmem:[%s1281_s23 + $0xc0] sm:$0xff]  ;;  %v75_v17 = vld [vmem:[%s1281_s23 + $0xb8] sm:$0xff] }
   0xe   :  { %120 = vmatpush.msra.mxu1 %v81_v5  ;;  %v58_v18 = vld [vmem:[%s1281_s23 + $0x30] sm:$0xff]  ;;  %v57_v20 = vld [vmem:[%s1281_s23 + $0x28] sm:$0xff]  ;;  %v56_v22 = vld [vmem:[%s1281_s23 + $0x20] sm:$0xff]  ;;  %286 = vmatpush.msra.mxu2 %v602_v48 }
   0xf   :  { %98 = vmatpush.msra.mxu0 %v64_v6  ;;  %v74_v19 = vld [vmem:[%s1281_s23 + $0xb0] sm:$0xff]  ;;  %v73_v21 = vld [vmem:[%s1281_s23 + $0xa8] sm:$0xff]  ;;  %v72_v23 = vld [vmem:[%s1281_s23 + $0xa0] sm:$0xff] }
  0x10   :  { %121 = vmatpush.msra.mxu1 %v80_v7  ;;  %v55_v24 = vld [vmem:[%s1281_s23 + $0x18] sm:$0xff]  ;;  %v54_v26 = vld [vmem:[%s1281_s23 + $0x10] sm:$0xff]  ;;  %v53_v30 = vld [vmem:[%s1281_s23 + $0x8] sm:$0xff]  ;;  %287 = vmatpush.msra.mxu2 %v601_v49 }
  0x11   :  { %99 = vmatpush.msra.mxu0 %v63_v8  ;;  %v71_v25 = vld [vmem:[%s1281_s23 + $0x98] sm:$0xff]  ;;  %v70_v27 = vld [vmem:[%s1281_s23 + $0x90] sm:$0xff]  ;;  %v69_v31 = vld [vmem:[%s1281_s23 + $0x88] sm:$0xff] }
  0x12   :  { %122 = vmatpush.msra.mxu1 %v79_v9  ;;  %v52_v33 = vld [vmem:[%s1281_s23] sm:$0xff]  ;;  %v87_v37 = vld [vmem:[%s1281_s23 + $0x118] sm:$0xff]  ;;  %v86_v38 = vld [vmem:[%s1281_s23 + $0x110] sm:$0xff]  ;;  %288 = vmatpush.msra.mxu2 %v600_v50 }
  0x13   :  { %100 = vmatpush.msra.mxu0 %v62_v10  ;;  %v68_v34 = vld [vmem:[%s1281_s23 + $0x80] sm:$0xff]  ;;  %v85_v39 = vld [vmem:[%s1281_s23 + $0x108] sm:$0xff]  ;;  %v250_v32 = vld [vmem:[%s1263_s6 + $0x18] sm:$0xff] }
  0x14   :  { %123 = vmatpush.msra.mxu1 %v78_v11  ;;  %v84_v40 = vld [vmem:[%s1281_s23 + $0x100] sm:$0xff]  ;;  %289 = vmatpush.msra.mxu2 %v599_v51  ;;  %v252_v28 = vld [vmem:[%s1263_s6 + $0x28] sm:$0xff]  ;;  %v611_v45 = vld [vmem:[%s1263_s6 + $0x110] sm:$0xff] }
  0x15   :  { %101 = vmatpush.msra.mxu0 %v61_v12  ;;  %v593_v57 = vld [vmem:[%s1263_s6 + $0x80] sm:$0xff]  ;;  %v624_v12 = vld [vmem:[%s1263_s6 + $0x178] sm:$0xff]  ;;  %v622_v29 = vld [vmem:[%s1263_s6 + $0x168] sm:$0xff] }
  0x16   :  { %124 = vmatpush.msra.mxu1 %v77_v13  ;;  %290 = vmatpush.msra.mxu2 %v598_v52  ;;  %v661_v62 = vld [vmem:[%s1265_s2] ss:$0 sm:$0xff]  ;;  %v623_v13 = vld [vmem:[%s1263_s6 + $0x170] sm:$0xff]  ;;  %v610_v46 = vld [vmem:[%s1263_s6 + $0x108] sm:$0xff] }
  0x17   :  { %102 = vmatpush.msra.mxu0 %v60_v14  ;;  %v662_v1 = vld [vmem:[%s1266_s3] ss:$0 sm:$0xff] }
  0x18   :  { %125 = vmatpush.msra.mxu1 %v76_v15  ;;  %291 = vmatpush.msra.mxu2 %v597_v53  ;;  %v959_v14 = vld [vmem:[%s1270_s4] sm:$0xff]  ;;  %v262_v15 = vld [vmem:[%s1263_s6 + $0x78] sm:$0xff] }
  0x19   :  { %103 = vmatpush.msra.mxu0 %v59_v16  ;;  %v261_v16 = vld [vmem:[%s1263_s6 + $0x70] sm:$0xff]  ;;  %v609_v47 = vld [vmem:[%s1263_s6 + $0x100] sm:$0xff] }
  0x1a   :  { %126 = vmatpush.msra.mxu1 %v75_v17  ;;  %292 = vmatpush.msra.mxu2 %v596_v54  ;;  %v972_v17 = vld [vmem:[%s1270_s4 + $0x8] sm:$0xff] }
  0x1b   :  { %104 = vmatpush.msra.mxu0 %v58_v18  ;;  %v260_v18 = vld [vmem:[%s1263_s6 + $0x68] sm:$0xff] }
  0x1c   :  { %127 = vmatpush.msra.mxu1 %v74_v19  ;;  %293 = vmatpush.msra.mxu2 %v595_v55  ;;  %v259_v19 = vld [vmem:[%s1263_s6 + $0x60] sm:$0xff] }
  0x1d   :  { %105 = vmatpush.msra.mxu0 %v57_v20  ;;  %v258_v20 = vld [vmem:[%s1263_s6 + $0x58] sm:$0xff]  ;;  %v663_v55 = vld [vmem:[%s1272_s7] ss:$0 sm:$0xff] }
  0x1e   :  { %128 = vmatpush.msra.mxu1 %v73_v21  ;;  %294 = vmatpush.msra.mxu2 %v594_v56  ;;  %v257_v21 = vld [vmem:[%s1263_s6 + $0x50] sm:$0xff] }
  0x1f   :  { %106 = vmatpush.msra.mxu0 %v56_v22  ;;  %v991_v22 = vld [vmem:[%s1271_s5] sm:$0xff] }
  0x20   :  { %129 = vmatpush.msra.mxu1 %v72_v23  ;;  %295 = vmatpush.msra.mxu2 %v593_v57  ;;  %v256_v23 = vld [vmem:[%s1263_s6 + $0x48] sm:$0xff] }
  0x21   :  { %107 = vmatpush.msra.mxu0 %v55_v24  ;;  %v255_v24 = vld [vmem:[%s1263_s6 + $0x40] sm:$0xff] }
  0x22   :  { %130 = vmatpush.msra.mxu1 %v71_v25  ;;  %v254_v25 = vld [vmem:[%s1263_s6 + $0x38] sm:$0xff] }
  0x23   :  { %108 = vmatpush.msra.mxu0 %v54_v26  ;;  %v253_v26 = vld [vmem:[%s1263_s6 + $0x30] sm:$0xff] }
  0x24   :  { %131 = vmatpush.msra.mxu1 %v70_v27  ;;  %v1010_v27 = vld [vmem:[%s1271_s5 + $0x8] sm:$0xff] }
  0x25   :  { %109 = vmatpush.msra.mxu0 %v53_v30  ;;  %v251_v30 = vld [vmem:[%s1263_s6 + $0x20] sm:$0xff] }
  0x26   :  { %132 = vmatpush.msra.mxu1 %v69_v31  ;;  %v621_v31 = vld [vmem:[%s1263_s6 + $0x160] sm:$0xff] }
  0x27   :  { %110 = vmatpush.msra.mxu0 %v52_v33  ;;  %v620_v33 = vld [vmem:[%s1263_s6 + $0x158] sm:$0xff] }
  0x28   :  { %133 = vmatpush.msra.mxu1 %v68_v34  ;;  %111 = vmatmul.f32.vlgmr.msra.gmra.mxu0 %v46_v35  ;;  %v249_v34 = vld [vmem:[%s1263_s6 + $0x10] sm:$0xff] }
  0x29   :  { %134 = vmatmul.f32.vlgmr.msra.gmra.mxu1 %v47_v36  ;;  %153 = vmatpush.msrb.mxu0 %v87_v37  ;;  %v619_v35 = vld [vmem:[%s1263_s6 + $0x150] sm:$0xff]  ;;  %v248_v36 = vld [vmem:[%s1263_s6 + $0x8] sm:$0xff] }
  0x2a   :  { %v618_v37 = vld [vmem:[%s1263_s6 + $0x148] sm:$0xff] }
  0x2b   :  { %154 = vmatpush.msrb.mxu0 %v86_v38  ;;  %v247_v38 = vld [vmem:[%s1263_s6] sm:$0xff] }
  0x2d   :  { %155 = vmatpush.msrb.mxu0 %v85_v39  ;;  %v617_v39 = vld [vmem:[%s1263_s6 + $0x140] sm:$0xff] }
  0x2f   :  { %156 = vmatpush.msrb.mxu0 %v84_v40  ;;  %v616_v40 = vld [vmem:[%s1263_s6 + $0x138] sm:$0xff] }
  0x30   :  { %114 = vmatmul.f32.gmra.mxu0 %v49_v41  ;;  %v615_v41 = vld [vmem:[%s1263_s6 + $0x130] sm:$0xff] }
  0x31   :  { %137 = vmatmul.f32.gmra.mxu1 %v50_v42  ;;  %343 = vmatpush.msra.mxu0 %v624_v12  ;;  %v614_v42 = vld [vmem:[%s1263_s6 + $0x128] sm:$0xff]  ;;  %v445_v12 = vld [vmem:[%s1275_s9 + $0x78] sm:$0xff] }
  0x33   :  { %344 = vmatpush.msra.mxu0 %v623_v13  ;;  %v444_v13 = vld [vmem:[%s1275_s9 + $0x70] sm:$0xff] }
  0x35   :  { %345 = vmatpush.msra.mxu0 %v622_v29  ;;  %v439_v29 = vld [vmem:[%s1275_s9 + $0x48] sm:$0xff] }
  0x37   :  { %346 = vmatpush.msra.mxu0 %v621_v31  ;;  %v633_v31 = vld [vmem:[%s1275_s9 + $0xa0] sm:$0xff] }
  0x38   :  { %587 = vmatmul.msk.f32.vlgmr.msrb.gmra.mxu0 %vm88_vm0, %v48_v43  ;;  %v613_v43 = vld [vmem:[%s1263_s6 + $0x120] sm:$0xff] }
  0x39   :  { %347 = vmatpush.msra.mxu0 %v620_v33  ;;  %v653_v33 = vld [vmem:[%s1275_s9 + $0x140] sm:$0xff] }
  0x3b   :  { %348 = vmatpush.msra.mxu0 %v619_v35  ;;  %v437_v35 = vld [vmem:[%s1275_s9 + $0x38] sm:$0xff] }
  0x3d   :  { %349 = vmatpush.msra.mxu0 %v618_v37  ;;  %v631_v37 = vld [vmem:[%s1275_s9 + $0x90] sm:$0xff] }
  0x3f   :  { %350 = vmatpush.msra.mxu0 %v617_v39  ;;  %v651_v39 = vld [vmem:[%s1275_s9 + $0x130] sm:$0xff] }
  0x40   :  { %588 = vmatmul.msk.f32.gmra.mxu0 %vm88_vm0, %v51_v44  ;;  %v612_v44 = vld [vmem:[%s1263_s6 + $0x118] sm:$0xff] }
  0x41   :  { %351 = vmatpush.msra.mxu0 %v616_v40  ;;  %v630_v40 = vld [vmem:[%s1275_s9 + $0x88] sm:$0xff] }
  0x43   :  { %352 = vmatpush.msra.mxu0 %v615_v41  ;;  %v435_v41 = vld [vmem:[%s1275_s9 + $0x28] sm:$0xff] }
  0x45   :  { %353 = vmatpush.msra.mxu0 %v614_v42  ;;  %v650_v42 = vld [vmem:[%s1275_s9 + $0x128] sm:$0xff] }
  0x47   :  { %354 = vmatpush.msra.mxu0 %v613_v43  ;;  %v629_v43 = vld [vmem:[%s1275_s9 + $0x80] sm:$0xff] }
  0x49   :  { %355 = vmatpush.msra.mxu0 %v612_v44  ;;  %v434_v44 = vld [vmem:[%s1275_s9 + $0x20] sm:$0xff] }
  0x4b   :  { %356 = vmatpush.msra.mxu0 %v611_v45  ;;  %v649_v45 = vld [vmem:[%s1275_s9 + $0x120] sm:$0xff] }
  0x4d   :  { %357 = vmatpush.msra.mxu0 %v610_v46  ;;  %v433_v46 = vld [vmem:[%s1275_s9 + $0x18] sm:$0xff] }
  0x4f   :  { %358 = vmatpush.msra.mxu0 %v609_v47  ;;  %v432_v47 = vld [vmem:[%s1275_s9 + $0x10] sm:$0xff] }
  0xa5   :  { %v112_v58 = vpop.f32.mrf.mxu0 }
  0xa6   :  { %v135_v60 = vpop.f32.mrf.mxu1 }
  0xa7   :  { %v136_v61 = vadd.f32 %v135_v60, %v112_v58  ;;  %v664_v58 = vld [vmem:[%s1273_s8] ss:$0 sm:$0xff] }
  0xad   :  { %v115_v59 = vpop.f32.mrf.mxu0 }
  0xae   :  { %v138_v3 = vpop.f32.mrf.mxu1 }
  0xaf   :  { %v139_v5 = vadd.f32 %v138_v3, %v115_v59 }
  0xb5   :  { %v158_v63 = vpop.f32.mrf.mxu0 }
  0xb6   :  { %v159_v0 = vadd.f32 %v158_v63, %v136_v61 }
  0xb8   :  { %164 = vst [vmem:[%s1267_s12] sm:$0xff] %v159_v0  ;;  %v170_v2 = vmul.f32 %v661_v62, %v159_v0 }
  0xba   :  { %v176_v4 = vadd.f32 %v662_v1, %v170_v2 }
  0xbc   :  { %178 = vst [vmem:[%s1268_s13] sm:$0xff] %v176_v4  ;;  %v180_v6 = vmax.f32 %v176_v4, 0.0 }
  0xbd   :  { %v161_v7 = vpop.f32.mrf.mxu0 }
  0xbe   :  { %182 = vst [vmem:[%s1269_s14] sm:$0xff] %v180_v6  ;;  %v162_v8 = vadd.f32 %v161_v7, %v139_v5  ;;  %296 = vmatmul.f32.vlgmr.msra.gmra.mxu2 %v180_v6  ;;  %v643_v7 = vld [vmem:[%s1275_s9 + $0xf0] sm:$0xff] }
  0xc0   :  { %165 = vst [vmem:[%s1267_s12 + $0x8] sm:$0xff] %v162_v8  ;;  %v171_v9 = vmul.f32 %v661_v62, %v162_v8  ;;  %v642_v8 = vld [vmem:[%s1275_s9 + $0xe8] sm:$0xff] }
  0xc2   :  { %v177_v10 = vadd.f32 %v662_v1, %v171_v9  ;;  %v641_v9 = vld [vmem:[%s1275_s9 + $0xe0] sm:$0xff] }
  0xc4   :  { %179 = vst [vmem:[%s1268_s13 + $0x8] sm:$0xff] %v177_v10  ;;  %v181_v11 = vmax.f32 %v177_v10, 0.0  ;;  %v640_v10 = vld [vmem:[%s1275_s9 + $0xd8] sm:$0xff] }
  0xc6   :  { %183 = vst [vmem:[%s1269_s14 + $0x8] sm:$0xff] %v181_v11  ;;  %209 = vmatpush.msra.mxu3 %v181_v11  ;;  %299 = vmatmul.f32.gmra.mxu2 %v181_v11 }
  0xc8   :  { %210 = vmatpush.msra.mxu3 %v180_v6 }
  0xc9   :  { %589 = vmatmul.msk.f32.vlgmr.msra.gmra.mxu3 %vm188_vm1, %v959_v14 }
  0xca   :  { %238 = vmatpush.msrb.mxu3 %v181_v11  ;;  %v639_v11 = vld [vmem:[%s1275_s9 + $0xd0] sm:$0xff] }
  0xcc   :  { %239 = vmatpush.msrb.mxu3 %v180_v6  ;;  %v644_v6 = vld [vmem:[%s1275_s9 + $0xf8] sm:$0xff] }
  0xce   :  { %303 = vmatpush.msra.mxu3 %v262_v15  ;;  %v638_v15 = vld [vmem:[%s1275_s9 + $0xc8] sm:$0xff] }
  0xd0   :  { %304 = vmatpush.msra.mxu3 %v261_v16  ;;  %v443_v16 = vld [vmem:[%s1275_s9 + $0x68] sm:$0xff] }
  0xd1   :  { %590 = vmatmul.msk.f32.gmra.mxu3 %vm188_vm1, %v972_v17 }
  0xd2   :  { %305 = vmatpush.msra.mxu3 %v260_v18  ;;  %v658_v18 = vld [vmem:[%s1275_s9 + $0x168] sm:$0xff] }
  0xd4   :  { %306 = vmatpush.msra.mxu3 %v259_v19  ;;  %v637_v19 = vld [vmem:[%s1275_s9 + $0xc0] sm:$0xff] }
  0xd6   :  { %307 = vmatpush.msra.mxu3 %v258_v20  ;;  %v442_v20 = vld [vmem:[%s1275_s9 + $0x60] sm:$0xff] }
  0xd8   :  { %308 = vmatpush.msra.mxu3 %v257_v21  ;;  %v657_v21 = vld [vmem:[%s1275_s9 + $0x160] sm:$0xff] }
  0xd9   :  { %591 = vmatmul.msk.f32.vlgmr.msrb.gmra.mxu3 %vm188_vm1, %v991_v22 }
  0xda   :  { %309 = vmatpush.msra.mxu3 %v256_v23  ;;  %v441_v23 = vld [vmem:[%s1275_s9 + $0x58] sm:$0xff] }
  0xdc   :  { %310 = vmatpush.msra.mxu3 %v255_v24  ;;  %v656_v24 = vld [vmem:[%s1275_s9 + $0x158] sm:$0xff] }
  0xde   :  { %311 = vmatpush.msra.mxu3 %v254_v25  ;;  %v635_v25 = vld [vmem:[%s1275_s9 + $0xb0] sm:$0xff] }
  0xe0   :  { %312 = vmatpush.msra.mxu3 %v253_v26  ;;  %v440_v26 = vld [vmem:[%s1275_s9 + $0x50] sm:$0xff] }
  0xe1   :  { %592 = vmatmul.msk.f32.gmra.mxu3 %vm188_vm1, %v1010_v27 }
  0xe2   :  { %313 = vmatpush.msra.mxu3 %v252_v28  ;;  %v634_v28 = vld [vmem:[%s1275_s9 + $0xa8] sm:$0xff] }
  0xe4   :  { %314 = vmatpush.msra.mxu3 %v251_v30  ;;  %v654_v30 = vld [vmem:[%s1275_s9 + $0x148] sm:$0xff] }
  0xe6   :  { %315 = vmatpush.msra.mxu3 %v250_v32  ;;  %v438_v32 = vld [vmem:[%s1275_s9 + $0x40] sm:$0xff] }
  0xe8   :  { %316 = vmatpush.msra.mxu3 %v249_v34  ;;  %v632_v34 = vld [vmem:[%s1275_s9 + $0x98] sm:$0xff] }
  0xea   :  { %317 = vmatpush.msra.mxu3 %v248_v36  ;;  %v652_v36 = vld [vmem:[%s1275_s9 + $0x138] sm:$0xff] }
  0xec   :  { %318 = vmatpush.msra.mxu3 %v247_v38  ;;  %v436_v38 = vld [vmem:[%s1275_s9 + $0x30] sm:$0xff] }
  0xee   :  { %486 = vmatpush.msrb.mxu3 %v445_v12 }
  0xf0   :  { %487 = vmatpush.msrb.mxu3 %v444_v13 }
  0xf2   :  { %488 = vmatpush.msrb.mxu3 %v443_v16 }
  0xf4   :  { %489 = vmatpush.msrb.mxu3 %v442_v20 }
  0xf6   :  { %490 = vmatpush.msrb.mxu3 %v441_v23 }
  0xf8   :  { %491 = vmatpush.msrb.mxu3 %v440_v26 }
  0xfa   :  { %492 = vmatpush.msrb.mxu3 %v439_v29 }
  0xfc   :  { %493 = vmatpush.msrb.mxu3 %v438_v32 }
  0xfe   :  { %494 = vmatpush.msrb.mxu3 %v437_v35 }
 0x100   :  { %495 = vmatpush.msrb.mxu3 %v436_v38 }
 0x102   :  { %496 = vmatpush.msrb.mxu3 %v435_v41 }
 0x104   :  { %497 = vmatpush.msrb.mxu3 %v434_v44 }
 0x106   :  { %498 = vmatpush.msrb.mxu3 %v433_v46 }
 0x108   :  { %499 = vmatpush.msrb.mxu3 %v432_v47 }
 0x141   :  { %v297_v53 = vpop.f32.mrf.mxu2 }
 0x149   :  { %v300_v62 = vpop.f32.mrf.mxu2 }
 0x14c   :  { %v212_v48 = vpop.f32.mrf.mxu3 }
 0x14d   :  { %319 = vmatmul.f32.vlgmr.msra.gmra.mxu3 %v212_v48  ;;  %v431_v48 = vld [vmem:[%s1275_s9 + $0x8] sm:$0xff] }
 0x14e   :  { %500 = vmatpush.msrb.mxu3 %v431_v48 }
 0x154   :  { %v215_v49 = vpop.f32.mrf.mxu3 }
 0x155   :  { %322 = vmatmul.f32.gmra.mxu3 %v215_v49  ;;  %v430_v49 = vld [vmem:[%s1275_s9] sm:$0xff] }
 0x156   :  { %501 = vmatpush.msrb.mxu3 %v430_v49 }
 0x15c   :  { %v241_v50 = vpop.f32.mrf.mxu3 }
 0x15d   :  { %359 = vmatmul.f32.vlgmr.msra.gmra.mxu0 %v241_v50  ;;  %v648_v50 = vld [vmem:[%s1275_s9 + $0x118] sm:$0xff] }
 0x164   :  { %v244_v51 = vpop.f32.mrf.mxu3 }
 0x165   :  { %362 = vmatmul.f32.gmra.mxu0 %v244_v51  ;;  %v647_v51 = vld [vmem:[%s1275_s9 + $0x110] sm:$0xff] }
 0x1d0   :  { %v320_v52 = vpop.f32.mrf.mxu3 }
 0x1d1   :  { %v321_v54 = vadd.f32 %v320_v52, %v297_v53  ;;  %v646_v52 = vld [vmem:[%s1275_s9 + $0x108] sm:$0xff]  ;;  %v645_v53 = vld [vmem:[%s1275_s9 + $0x100] sm:$0xff] }
 0x1d8   :  { %v323_v60 = vpop.f32.mrf.mxu3 }
 0x1d9   :  { %v324_v63 = vadd.f32 %v323_v60, %v300_v62 }
 0x1da   :  { %v360_v56 = vpop.f32.mrf.mxu0 }
 0x1db   :  { %v366_v57 = vadd.f32 %v360_v56, %v321_v54 }
 0x1dd   :  { %v372_v59 = vmul.f32 %v663_v55, %v366_v57 }
 0x1df   :  { %v378_v61 = vadd.f32 %v664_v58, %v372_v59 }
 0x1e1   :  { %v1080_v0 = vmax.f32 %v378_v61, 0.0  ;;  %v665_v61 = vld [vmem:[%s1276_s10] ss:$0 sm:$0xff] }
 0x1e2   :  { %v363_v1 = vpop.f32.mrf.mxu0 }
 0x1e3   :  { %382 = vst [vmem:[%s1274_s15] sm:$0xff] %v1080_v0  ;;  %v367_v2 = vadd.f32 %v363_v1, %v324_v63 }
 0x1e5   :  { %v373_v3 = vmul.f32 %v663_v55, %v367_v2 }
 0x1e7   :  { %v379_v4 = vadd.f32 %v664_v58, %v373_v3 }
 0x1e9   :  { %v1086_v5 = vmax.f32 %v379_v4, 0.0 }
 0x1eb   :  { %383 = vst [vmem:[%s1274_s15 + $0x8] sm:$0xff] %v1086_v5  ;;  %398 = vmatpush.msrb.mxu1 %v1086_v5  ;;  %421 = vmatpush.msrb.mxu2 %v1086_v5 }
 0x1ed   :  { %399 = vmatpush.msrb.mxu1 %v1080_v0  ;;  %422 = vmatpush.msrb.mxu2 %v1080_v0 }
 0x1ee   :  { %625 = vmatmul.msk.f32.vlgmr.msrb.gmra.mxu1 %vm188_vm1, %v959_v14  ;;  %627 = vmatmul.msk.f32.vlgmr.msrb.gmra.mxu2 %vm188_vm1, %v991_v22  ;;  %v660_v14 = vld [vmem:[%s1275_s9 + $0x178] sm:$0xff] }
 0x1ef   :  { %463 = vmatpush.msra.mxu1 %v644_v6  ;;  %526 = vmatpush.msra.mxu2 %v660_v14  ;;  %v636_v22 = vld [vmem:[%s1275_s9 + $0xb8] sm:$0xff] }
 0x1f1   :  { %464 = vmatpush.msra.mxu1 %v643_v7 }
 0x1f3   :  { %465 = vmatpush.msra.mxu1 %v642_v8 }
 0x1f5   :  { %466 = vmatpush.msra.mxu1 %v641_v9 }
 0x1f6   :  { %626 = vmatmul.msk.f32.gmra.mxu1 %vm188_vm1, %v972_v17  ;;  %628 = vmatmul.msk.f32.gmra.mxu2 %vm188_vm1, %v1010_v27  ;;  %v659_v17 = vld [vmem:[%s1275_s9 + $0x170] sm:$0xff] }
 0x1f7   :  { %467 = vmatpush.msra.mxu1 %v640_v10  ;;  %527 = vmatpush.msra.mxu2 %v659_v17  ;;  %v655_v27 = vld [vmem:[%s1275_s9 + $0x150] sm:$0xff] }
 0x1f9   :  { %468 = vmatpush.msra.mxu1 %v639_v11  ;;  %528 = vmatpush.msra.mxu2 %v658_v18 }
 0x1fb   :  { %469 = vmatpush.msra.mxu1 %v638_v15  ;;  %529 = vmatpush.msra.mxu2 %v657_v21 }
 0x1fd   :  { %470 = vmatpush.msra.mxu1 %v637_v19  ;;  %530 = vmatpush.msra.mxu2 %v656_v24 }
 0x1ff   :  { %471 = vmatpush.msra.mxu1 %v636_v22  ;;  %531 = vmatpush.msra.mxu2 %v655_v27 }
 0x201   :  { %472 = vmatpush.msra.mxu1 %v635_v25  ;;  %532 = vmatpush.msra.mxu2 %v654_v30 }
 0x203   :  { %473 = vmatpush.msra.mxu1 %v634_v28  ;;  %533 = vmatpush.msra.mxu2 %v653_v33 }
 0x205   :  { %474 = vmatpush.msra.mxu1 %v633_v31  ;;  %534 = vmatpush.msra.mxu2 %v652_v36 }
 0x207   :  { %475 = vmatpush.msra.mxu1 %v632_v34  ;;  %535 = vmatpush.msra.mxu2 %v651_v39 }
 0x209   :  { %476 = vmatpush.msra.mxu1 %v631_v37  ;;  %536 = vmatpush.msra.mxu2 %v650_v42 }
 0x20b   :  { %477 = vmatpush.msra.mxu1 %v630_v40  ;;  %537 = vmatpush.msra.mxu2 %v649_v45 }
 0x20d   :  { %478 = vmatpush.msra.mxu1 %v629_v43  ;;  %538 = vmatpush.msra.mxu2 %v648_v50 }
 0x20e   :  { %479 = vmatmul.f32.vlgmr.msra.gmra.mxu1 %v1080_v0  ;;  %v666_v0 = vld [vmem:[%s1277_s11] ss:$0 sm:$0xff] }
 0x20f   :  { %539 = vmatpush.msra.mxu2 %v647_v51 }
 0x211   :  { %540 = vmatpush.msra.mxu2 %v646_v52 }
 0x213   :  { %541 = vmatpush.msra.mxu2 %v645_v53 }
 0x216   :  { %482 = vmatmul.f32.gmra.mxu1 %v1086_v5 }
 0x26b   :  { %v401_v54 = vpop.f32.mrf.mxu1 }
 0x26c   :  { %502 = vmatmul.f32.vlgmr.msrb.gmra.mxu3 %v401_v54 }
 0x271   :  { %v424_v55 = vpop.f32.mrf.mxu2 }
 0x272   :  { %542 = vmatmul.f32.vlgmr.msra.gmra.mxu2 %v424_v55 }
 0x273   :  { %v404_v56 = vpop.f32.mrf.mxu1 }
 0x274   :  { %505 = vmatmul.f32.gmra.mxu3 %v404_v56 }
 0x279   :  { %v427_v57 = vpop.f32.mrf.mxu2 }
 0x27a   :  { %545 = vmatmul.f32.gmra.mxu2 %v427_v57 }
 0x28b   :  { %v480_v59 = vpop.f32.mrf.mxu1 }
 0x293   :  { %v483_v4 = vpop.f32.mrf.mxu1 }
 0x2ef   :  { %v503_v58 = vpop.f32.mrf.mxu3 }
 0x2f0   :  { %v504_v60 = vadd.f32 %v503_v58, %v480_v59 }
 0x2f5   :  { %v543_v62 = vpop.f32.mrf.mxu2 }
 0x2f6   :  { %v549_v63 = vadd.f32 %v543_v62, %v504_v60 }
 0x2f7   :  { %v506_v2 = vpop.f32.mrf.mxu3 }
 0x2f8   :  { %v555_v1 = vmul.f32 %v665_v61, %v549_v63  ;;  %v507_v6 = vadd.f32 %v506_v2, %v483_v4 }
 0x2fa   :  { %v561_v3 = vadd.f32 %v666_v0, %v555_v1 }
 0x2fc   :  { %v563_v5 = vmax.f32 %v561_v3, 0.0 }
 0x2fd   :  { %v546_v7 = vpop.f32.mrf.mxu2 }
 0x2fe   :  { %565 = vst [vmem:[%s1278_s16] sm:$0xff] %v563_v5  ;;  %v550_v8 = vadd.f32 %v546_v7, %v507_v6 }
 0x300   :  { %v556_v9 = vmul.f32 %v665_v61, %v550_v8 }
 0x302   :  { %v562_v10 = vadd.f32 %v666_v0, %v556_v9 }
 0x304   :  { %v564_v11 = vmax.f32 %v562_v10, 0.0 }
 0x306   :  { %566 = vst [vmem:[%s1278_s16 + $0x8] sm:$0xff] %v564_v11 }

</bundles_post_ra>
